<compile_context>
chip_gen: v7x
topology: tpu7x:2x2x1
jax: 0.10.0
libtpu: 0.0.40
codegen_flags: <defaults>
</compile_context>

<pallas_src>
import math

import jax
import jax.numpy as jnp
from jax.experimental import pallas as pl
from jax.experimental.pallas import tpu as pltpu


def _scale_kernel(s_ref, x_ref, o_ref):
    # s_ref: (1, 1) f32 scalar in SMEM; x_ref/o_ref: (block_rows, lanes) VMEM tiles.
    s = s_ref[0, 0]
    o_ref[...] = (x_ref[...].astype(jnp.float32) * s).astype(o_ref.dtype)


def _block_config():
    """(target_block_bytes, vmem_limit_bytes) tuned per TPU generation."""
    kind = ""
    try:
        kind = jax.devices()[0].device_kind.lower()
    except Exception:
        pass
    if "v7" in kind:
        # 8 MiB blocks -> 32 MiB double-buffered in+out; raise the scoped-VMEM
        # limit explicitly and leave headroom under the 64 MiB physical VMEM.
        # TODO(synk): verify via xprof that the "parallel" grid axis is sharded
        #             across both v7x TensorCores; if not, try CORE_PARALLEL.
        return 8 * 1024 * 1024, 48 * 1024 * 1024
    if "v6" in kind:
        # 4 MiB blocks -> 16 MiB double-buffered, half of the 32 MiB default.
        return 4 * 1024 * 1024, None
    # v5e (16 MiB scoped-VMEM default) and unknown chips: stay conservative.
    return 2 * 1024 * 1024, None


def scale_forward(x: jax.Array, scale, *, min_pallas_bytes: int = 256 * 1024) -> jax.Array:
    """Elementwise `scale * x`, matching Scale.forward semantics.

    x:     any-rank array (NCHW for conv features).
    scale: python scalar or shape-(1,) parameter (as in the PyTorch module).
    """
    orig_shape = x.shape
    dtype = x.dtype
    total = math.prod(orig_shape) if orig_shape else 1
    itemsize = jnp.dtype(dtype).itemsize

    # Scale kept in f32 (PyTorch parameter dtype); compute in f32, cast back.
    s2d = jnp.asarray(scale, dtype=jnp.float32).reshape(-1)[:1].reshape(1, 1)

    # Tiny-input fast path: pallas_call launch/pipeline overhead dominates and
    # a plain multiply lets XLA fuse the scale into producer/consumer for free.
    if total == 0 or total * itemsize < min_pallas_bytes:
        return (x.astype(jnp.float32) * s2d[0, 0]).astype(dtype)

    # Sublane packing: 8 rows for 32-bit, 16 for 16-bit, 32 for 8-bit dtypes.
    sub = {4: 8, 2: 16, 1: 32}.get(itemsize, 8)

    # Lane width: largest multiple of 128 (<= 1024) that divides `total`.
    # If none does, run the lane-aligned prefix through the kernel and handle
    # the (< 1024 element) tail in plain jnp.
    lanes = 1024
    for cand in (1024, 512, 256, 128):
        if total % cand == 0:
            lanes = cand
            break
    main = (total // lanes) * lanes
    tail = total - main
    if main == 0:
        # Degenerate (only reachable with a tiny forced input).
        return (x.astype(jnp.float32) * s2d[0, 0]).astype(dtype)

    rows = main // lanes

    target_bytes, vmem_limit = _block_config()
    max_block_rows = max(sub, (target_bytes // (lanes * itemsize)) // sub * sub)
    if rows <= max_block_rows:
        # Single block covering the whole (rows, lanes) view: a block dim equal
        # to the full array dim is exempt from the (8,128) divisibility rule.
        block_rows = rows
    else:
        # Multiple of `sub`; partial last block handled by Pallas (writes are
        # masked, OOB reads are harmless for this elementwise op).
        block_rows = max_block_rows

    x_flat = x.reshape(total)
    x_main = x_flat[:main] if tail else x_flat
    x2d = x_main.reshape(rows, lanes)

    grid = (pl.cdiv(rows, block_rows),)

    out2d = pl.pallas_call(
        _scale_kernel,
        out_shape=jax.ShapeDtypeStruct((rows, lanes), dtype),
        grid=grid,
        in_specs=[
            pl.BlockSpec(memory_space=pltpu.MemorySpace.SMEM),      # scale scalar
            pl.BlockSpec((block_rows, lanes), lambda i: (i, 0)),    # input tile
        ],
        out_specs=pl.BlockSpec((block_rows, lanes), lambda i: (i, 0)),
        compiler_params=pltpu.CompilerParams(
            dimension_semantics=("parallel",),
            vmem_limit_bytes=vmem_limit,
        ),
    )(s2d, x2d)

    out_flat = out2d.reshape(main)
    if tail:
        # Rare path (total not divisible by 128): tiny tail in plain jnp.
        out_tail = (x_flat[main:].astype(jnp.float32) * s2d[0, 0]).astype(dtype)
        out_flat = jnp.concatenate([out_flat, out_tail])
    return out_flat.reshape(orig_shape)


if __name__ == "__main__":
    key = jax.random.PRNGKey(0)

    # 1) Small NCHW input (conv feature map analogue). Force the Pallas path so
    #    the kernel itself is exercised even though this input is tiny.
    N, C, H, W = 2, 4, 16, 16
    x = jax.random.normal(key, (N, C, H, W), dtype=jnp.float32)
    scale = jnp.array([3.5], dtype=jnp.float32)   # Scale(scale=3.5) analogue
    out = jax.block_until_ready(scale_forward(x, scale, min_pallas_bytes=0))
    assert out.shape == x.shape and out.dtype == x.dtype
    assert jnp.allclose(out, scale * x, rtol=1e-6, atol=1e-6)

    # 2) Facerec-like feature map: multi-block Pallas path with a partial last
    #    block (no padding, no extra HBM passes).
    x_big = jax.random.normal(jax.random.PRNGKey(1), (1, 64, 112, 96), dtype=jnp.float32)
    out_big = jax.block_until_ready(scale_forward(x_big, scale))
    assert out_big.shape == x_big.shape and out_big.dtype == x_big.dtype
    assert jnp.allclose(out_big, scale * x_big, rtol=1e-6, atol=1e-6)

    # 3) Total not divisible by 128: lane-aligned prefix through the kernel,
    #    tiny tail in plain jnp.
    x_odd = jax.random.normal(jax.random.PRNGKey(2), (2, 3, 113, 97), dtype=jnp.float32)
    out_odd = jax.block_until_ready(scale_forward(x_odd, 0.25, min_pallas_bytes=0))
    assert out_odd.shape == x_odd.shape and out_odd.dtype == x_odd.dtype
    assert jnp.allclose(out_odd, 0.25 * x_odd, rtol=1e-6, atol=1e-6)

    # 4) Tiny input: plain-JAX fast path.
    x_tiny = jax.random.normal(jax.random.PRNGKey(3), (3, 5, 7, 9), dtype=jnp.float32)
    out_tiny = jax.block_until_ready(scale_forward(x_tiny, 0.5))
    assert out_tiny.shape == x_tiny.shape and out_tiny.dtype == x_tiny.dtype
    assert jnp.allclose(out_tiny, 0.5 * x_tiny, rtol=1e-6, atol=1e-6)

    print("KERNEL_OK")
</pallas_src>

<mosaic_0001>
module attributes {stable_mosaic.version = 11 : i64} {
  func.func @_scale_kernel(%arg0: i32, %arg1: memref<1x1xf32, #tpu.memory_space<smem>>, %arg2: memref<2x1024xf32, #tpu.memory_space<vmem>>, %arg3: memref<2x1024xf32, #tpu.memory_space<vmem>>) attributes {dimension_semantics = [#tpu.dimension_semantics<parallel>], iteration_bounds = array<i64: 1>, scalar_prefetch = 0 : i64, scratch_operands = 0 : i64, tpu.core_type = #tpu.core_type<tc>, window_params = [{transform_indices = @transform_0, window_bounds = array<i64: 1, 1>}, {transform_indices = @transform_1, window_bounds = array<i64: 2, 1024>}, {transform_indices = @transform_2, window_bounds = array<i64: 2, 1024>}]} {
    %c0 = arith.constant 0 : index
    %c0_0 = arith.constant 0 : index
    %0 = memref.load %arg1[%c0, %c0_0] : memref<1x1xf32, #tpu.memory_space<smem>>
    %c0_1 = arith.constant 0 : index
    %c0_2 = arith.constant 0 : index
    %1 = vector.load %arg2[%c0_1, %c0_2] : memref<2x1024xf32, #tpu.memory_space<vmem>>, vector<2x1024xf32>
    %2 = vector.broadcast %0 : f32 to vector<2x1024xf32>
    %3 = arith.mulf %1, %2 : vector<2x1024xf32>
    %c0_3 = arith.constant 0 : index
    %c0_4 = arith.constant 0 : index
    %4 = vector.load %arg3[%c0_3, %c0_4] : memref<2x1024xf32, #tpu.memory_space<vmem>>, vector<2x1024xf32>
    tpu.vector_store %arg3[%c0_3, %c0_4], %3 {strides = array<i32>} : memref<2x1024xf32, #tpu.memory_space<vmem>>, vector<2x1024xf32>,
    return
  }
  func.func @transform_0(%arg0: i32) -> (i32, i32) {
    %c0_i32 = arith.constant 0 : i32
    %c0_i32_0 = arith.constant 0 : i32
    %c0_i32_1 = arith.constant 0 : i32
    return %c0_i32, %c0_i32_0 : i32, i32
  }
  func.func @transform_1(%arg0: i32) -> (i32, i32) {
    %c0_i32 = arith.constant 0 : i32
    %c0_i32_0 = arith.constant 0 : i32
    return %arg0, %c0_i32 : i32, i32
  }
  func.func @transform_2(%arg0: i32) -> (i32, i32) {
    %c0_i32 = arith.constant 0 : i32
    %c0_i32_0 = arith.constant 0 : i32
    return %arg0, %c0_i32 : i32, i32
  }
}

</mosaic_0001>

<bundles_post_ra>
// kernel: tpu_custom_call.1
= control target key start
LH: loop header
LB: loop body
LE: loop exit
PB: predicated region body
PF: predicated region fallthrough
CT: control target
= control target key end

     0   :  { %8 = vsyncpa [#allocation4], 0  ;;  %s142_s0 = inlined_call_operand.<no memory space> [shape: f32[1,1], index: 0, kind: input, shape index: {}]   ;;  %s143_s1 = inlined_call_operand.hbm [shape: f32[2,1024], index: 1, kind: input, shape index: {}]   ;;  %s144_s2 = inlined_call_operand.hbm [shape: f32[2,1024], index: 2, kind: output, shape index: {}]  }
   0x1   :  { %9 = vsyncpa [#allocation5], 0  ;;  %s98_s9 = smov [#allocation3]   ;;  %s50_s13 = scalar_lea.hbm %s143_s1, 256 }
   0x2   :  { %s18_s10 = sshll.u32 %s98_s9, 4  ;;  %p51_p0 = scmp.ne.s32.totalorder %s143_s1, %s50_s13  ;;  %s19_s10 = int_to_ptr.vmem [resolvable:$true] %s18_s10 }
   0x3   :  { %p54_p1 = scmp.lt.u32.totalorder %s50_s13, %s143_s1 }
   0x5   :  { %p56_p2 = pnand %p54_p1, %p51_p0 }
   0x7   :  { %59 = shalt.err (!%p56_p2)
}
   0x8   :  { %s60_s18 = scalar_lea.vmem %s19_s10, 256  ;;  %p65_p4 = scmp.lt.s32.totalorder %s19_s10, %s19_s10 }
   0x9   :  { %p61_p3 = scmp.ne.s32.totalorder %s19_s10, %s60_s18  ;;  %p66_p5 = scmp.lt.s32.totalorder %s60_s18, %s60_s18 }
   0xb   :  { %p67_p6 = por %p66_p5, %p65_p4 }
   0xd   :  { %p68_p7 = pnand %p67_p6, %p61_p3 }
   0xf   :  { %71 = shalt.err (!%p68_p7)
}
  0x10   :  { %21 = dma.hbm_to_vmem [thread:$0]  %s143_s1, 256, %s19_s10, [#allocation4]  }
  0x11   :  { %94 = dma.done.wait [#allocation4], 256  }
  0x12   :  { %95 = vsyncadd [#allocation4], 4294967040  ;;  %v28_v0 = vstv %s142_s0  ;;  %s99_s23 = smov [#allocation6]   ;;  %v26_v1 = vld [vmem:[#allocation3] sm:$0xff]  ;;  %v27_v2 = vld [vmem:[#allocation3 + $0x8] sm:$0xff] }
  0x13   :  { %s39_s24 = sshll.u32 %s99_s23, 4  ;;  %v29_v3 = vmul.f32 %v28_v0, %v26_v1  ;;  %v30_v4 = vmul.f32 %v28_v0, %v27_v2  ;;  %s40_s24 = int_to_ptr.vmem [resolvable:$true] %s39_s24 }
  0x14   :  { %s72_s25 = scalar_lea.vmem %s40_s24, 256  ;;  %p77_p9 = scmp.lt.s32.totalorder %s40_s24, %s40_s24 }
  0x15   :  { %31 = vst [vmem:[#allocation6] sm:$0xff] %v29_v3  ;;  %32 = vst [vmem:[#allocation6 + $0x8] sm:$0xff] %v30_v4  ;;  %p73_p8 = scmp.ne.s32.totalorder %s40_s24, %s72_s25  ;;  %p78_p10 = scmp.lt.s32.totalorder %s72_s25, %s72_s25 }
  0x17   :  { %p79_p11 = por %p78_p10, %p77_p9 }
  0x19   :  { %p80_p12 = pnand %p79_p11, %p73_p8 }
  0x1b   :  { %83 = shalt.err (!%p80_p12)
}
  0x1c   :  { %s84_s0 = scalar_lea.hbm %s144_s2, 256 }
  0x1d   :  { %p85_p13 = scmp.ne.s32.totalorder %s144_s2, %s84_s0  ;;  %p88_p0 = scmp.lt.u32.totalorder %s84_s0, %s144_s2 }
  0x1f   :  { %p90_p1 = pnand %p88_p0, %p85_p13 }
  0x21   :  { %93 = shalt.err (!%p90_p1)
}
  0x22   :  { %42 = dma.vmem_to_hbm [thread:$0]  %s40_s24, 256, %s144_s2, [#allocation5]  }
  0x23   :  { %96 = dma.done.wait [#allocation5], 256  }
  0x24   :  { %97 = vsyncadd [#allocation5], 4294967040 }
  0x25   :  { %46 = vsyncpa [#allocation4], 1 }
  0x26   :  { %47 = vsyncpa [#allocation5], 1 }

</bundles_post_ra>
